<compile_context>
chip_gen: v7x
topology: tpu7x:2x2x1
jax: 0.10.0
libtpu: 0.0.40
codegen_flags: <defaults>
</compile_context>

<pallas_src>
import math
from functools import partial

import jax
import jax.numpy as jnp
from jax import lax
from jax.experimental import pallas as pl
from jax.experimental.pallas import tpu as pltpu

EPS = 1e-5  # nn.LayerNorm default


def _patch_expand_kernel(x_ref, w_ref, s_ref, g_ref, b_ref, o_ref, *, compute_dtype):
    # x_ref: (rows*W, C)  tokens, ORIGINAL dtype (cast in-kernel)
    # w_ref: (C, 2C)      expand weight, compute dtype
    # s_ref: (c2, c2)     f32 block-diagonal group selector (2 groups of c_out)
    # g_ref/b_ref: (1, c2) f32 gamma/beta tiled over the p2 axis
    # o_ref: (rows, 2, W, c2)  with c2 == 2*c_out == C
    rows, _, W, c2 = o_ref.shape
    c_out = c2 // 2
    inv_c = jnp.float32(1.0 / c_out)

    # In-kernel cast: no extra HBM pass over the activations.
    x = x_ref[...].astype(compute_dtype)          # (T, C)
    sel = s_ref[...]                              # (c2, c2) f32, 0/1 entries
    gamma = g_ref[...]                            # (1, c2) f32
    beta = b_ref[...]

    # Channel layout of the expand output is (p1, p2, c): each 128-lane half of
    # the 2C output channels is exactly one p1 slab of the pixel shuffle.
    # Process slab-by-slab so only one (T, c2) f32 intermediate is live.
    for p1 in range(2):
        w_slab = w_ref[:, p1 * c2:(p1 + 1) * c2]                           # (C, c2)
        y = jnp.dot(x, w_slab, preferred_element_type=jnp.float32)         # (T, c2) f32
        # Per-(p2)-group LayerNorm stats via MXU selector matmuls: dot(., S)
        # sums within each c_out-wide group and broadcasts back full-width.
        mean = jnp.dot(y, sel, preferred_element_type=jnp.float32) * inv_c
        cent = y - mean
        var = jnp.dot(cent * cent, sel, preferred_element_type=jnp.float32) * inv_c
        out = cent * lax.rsqrt(var + EPS) * gamma + beta                   # rsqrt -> EUP
        o_ref[:, p1, :, :] = out.reshape(rows, W, c2).astype(o_ref.dtype)


def patch_expand_2d(x, w_t, gamma, beta, dim_scale=2, *,
                    compute_dtype=jnp.bfloat16, out_dtype=None):
    """x: (B, H, W, C) with C == 2*dim ; w_t: (C, dim_scale*C) (pre-transposed
    nn.Linear weight) ; gamma/beta: (C // dim_scale,).  Returns (B, 2H, 2W, C//2)."""
    assert dim_scale == 2, "kernel specialised for dim_scale=2 (as in MambaAD)"
    B, H, W, C = x.shape
    assert C % dim_scale == 0
    c_out = C // dim_scale           # LayerNorm width (= original `dim`)
    c2 = dim_scale * c_out           # one output slab (== C), 128-lane dense for dim>=64
    R = B * H
    T = R * W
    out_dtype = x.dtype if out_dtype is None else jnp.dtype(out_dtype)

    x2 = x.reshape(T, C)             # free view; dtype untouched (cast happens in-kernel)
    w = w_t.astype(compute_dtype)    # tiny one-time cast of the (C, 2C) weight
    grp = jnp.arange(c2, dtype=jnp.int32) // c_out
    sel = (grp[:, None] == grp[None, :]).astype(jnp.float32)        # (c2, c2) block-diag ones
    g2 = jnp.tile(gamma.astype(jnp.float32), dim_scale).reshape(1, c2)
    b2 = jnp.tile(beta.astype(jnp.float32), dim_scale).reshape(1, c2)

    # ---- generation-aware block sizing --------------------------------------
    try:
        vmem_phys = pltpu.get_tpu_info().vmem_capacity_bytes
    except Exception:
        vmem_phys = 128 << 20
    if vmem_phys <= (64 << 20):
        # v7x: 64 MiB VMEM, 2 TensorCores -> smaller blocks, >=2 steps per core.
        target_tokens, min_grid, vmem_limit = 4096, 4, 48 << 20
    else:
        # v5e / v6e: 128 MiB VMEM, 1 TensorCore -> big blocks, no grid-step clamp.
        target_tokens, min_grid, vmem_limit = 8192, 1, 64 << 20

    in_sz = jnp.dtype(x.dtype).itemsize
    out_sz = jnp.dtype(out_dtype).itemsize
    cmp_sz = jnp.dtype(compute_dtype).itemsize
    # Per-token VMEM: double-buffered input+output blocks plus ~3 live f32 slabs.
    per_token = 2 * (C * in_sz + dim_scale * C * out_sz) + 3 * c2 * 4
    const_bytes = 2 * (C * dim_scale * C * cmp_sz + c2 * c2 * 4 + 4 * c2 * 4) + (1 << 20)
    budget_tokens = max(W, (vmem_limit - const_bytes) // per_token)
    target_tokens = min(target_tokens, budget_tokens)

    rows = max(1, min(R, target_tokens // max(W, 1)))
    if min_grid > 1 and R >= min_grid:
        rows = min(rows, pl.cdiv(R, min_grid))      # keep >= min_grid grid steps
    # Keep the input block's sublane dim (rows*W) 8-aligned where possible.
    sub = 8 // math.gcd(W, 8)
    if rows % sub and rows > sub:
        rows = (rows // sub) * sub
    if (rows * W) % 8 and rows * W != T:
        rows = R                                    # single full block (always legal)
    grid = (pl.cdiv(R, rows),)                      # partial last block masked by Pallas

    cost = pl.CostEstimate(
        flops=2 * T * C * (dim_scale * C) + dim_scale * 2 * (2 * T * c2 * c2),
        transcendentals=T * dim_scale * dim_scale,   # one rsqrt per LN group
        bytes_accessed=(T * C * in_sz
                        + C * dim_scale * C * cmp_sz
                        + c2 * c2 * 4
                        + T * dim_scale * C * out_sz),
    )

    out = pl.pallas_call(
        partial(_patch_expand_kernel, compute_dtype=compute_dtype),
        out_shape=jax.ShapeDtypeStruct((R, dim_scale, W, c2), out_dtype),
        grid_spec=pltpu.PrefetchScalarGridSpec(
            num_scalar_prefetch=0,
            grid=grid,
            in_specs=[
                pl.BlockSpec((rows * W, C), lambda i: (i, 0)),        # token-major 2-D
                pl.BlockSpec((C, dim_scale * C), lambda i: (0, 0)),   # weight (resident)
                pl.BlockSpec((c2, c2), lambda i: (0, 0)),             # group selector
                pl.BlockSpec((1, c2), lambda i: (0, 0)),              # gamma
                pl.BlockSpec((1, c2), lambda i: (0, 0)),              # beta
            ],
            out_specs=pl.BlockSpec((rows, dim_scale, W, c2),
                                   lambda i: (i, 0, 0, 0)),
        ),
        compiler_params=pltpu.CompilerParams(
            dimension_semantics=("parallel",),
            vmem_limit_bytes=vmem_limit),
        cost_estimate=cost,
    )(x2, w, sel, g2, b2)

    # Kernel output is (B*H, p1, W, p2*c) -> (B, 2H, 2W, c_out) is a PURE reshape.
    return out.reshape(B, H * dim_scale, W * dim_scale, c_out)


def reference(x, w_t, gamma, beta, dim_scale=2):
    B, H, W, C = x.shape
    c_out = C // dim_scale
    y = jnp.einsum("bhwc,cd->bhwd",
                   x.astype(jnp.float32), w_t.astype(jnp.float32))
    y = y.reshape(B, H, W, dim_scale, dim_scale, c_out)
    y = y.transpose(0, 1, 3, 2, 4, 5).reshape(
        B, H * dim_scale, W * dim_scale, c_out)
    mean = y.mean(-1, keepdims=True)
    var = ((y - mean) ** 2).mean(-1, keepdims=True)
    return (y - mean) / jnp.sqrt(var + EPS) * gamma + beta


if __name__ == "__main__":
    # Module config: dim=64 -> input channels C = 2*dim = 128, output = dim = 64.
    dim = 64
    dim_scale = 2
    C = 2 * dim
    B, H, W = 2, 8, 8

    key = jax.random.PRNGKey(0)
    kx, kw, kg, kb = jax.random.split(key, 4)
    x = jax.random.normal(kx, (B, H, W, C), dtype=jnp.float32)
    # nn.Linear(2*dim, dim_scale*2*dim, bias=False).weight is (2C, C);
    # stored pre-transposed as (C, 2C) so y = x @ w_t.
    w_t = jax.random.normal(kw, (C, dim_scale * C), dtype=jnp.float32) * 0.02
    gamma = 1.0 + 0.1 * jax.random.normal(kg, (dim,), dtype=jnp.float32)
    beta = 0.1 * jax.random.normal(kb, (dim,), dtype=jnp.float32)

    # f32 compute path: tight check against the plain-JAX reference.
    out_f32 = patch_expand_2d(x, w_t, gamma, beta, dim_scale=dim_scale,
                              compute_dtype=jnp.float32)
    out_f32 = jax.block_until_ready(out_f32)
    ref_f32 = reference(x, w_t, gamma, beta, dim_scale=dim_scale)
    assert out_f32.shape == (B, H * dim_scale, W * dim_scale, dim), out_f32.shape
    assert jnp.allclose(out_f32, ref_f32, atol=2e-3, rtol=2e-3)

    # Default bf16 matmul path: compare against the reference fed the same
    # bf16-quantised inputs (f32 accumulation on both sides).
    out_bf16 = patch_expand_2d(x, w_t, gamma, beta, dim_scale=dim_scale,
                               compute_dtype=jnp.bfloat16)
    out_bf16 = jax.block_until_ready(out_bf16)
    ref_bf16 = reference(x.astype(jnp.bfloat16), w_t.astype(jnp.bfloat16),
                         gamma, beta, dim_scale=dim_scale)
    assert out_bf16.shape == (B, H * dim_scale, W * dim_scale, dim)
    assert jnp.allclose(out_bf16, ref_bf16, atol=1e-2, rtol=1e-2)

    # bf16-output lever (largest HBM stream halved) — loose value check.
    out_b16o = patch_expand_2d(x, w_t, gamma, beta, dim_scale=dim_scale,
                               out_dtype=jnp.bfloat16)
    out_b16o = jax.block_until_ready(out_b16o)
    assert out_b16o.dtype == jnp.bfloat16
    assert jnp.allclose(out_b16o.astype(jnp.float32), ref_bf16, atol=3e-2, rtol=3e-2)

    print("KERNEL_OK")
</pallas_src>

<mosaic_0001>
module attributes {stable_mosaic.version = 11 : i64} {
  func.func @_patch_expand_kernel(%arg0: i32, %arg1: memref<128x128xf32, #tpu.memory_space<vmem>>, %arg2: memref<128x256xf32, #tpu.memory_space<vmem>>, %arg3: memref<128x128xf32, #tpu.memory_space<vmem>>, %arg4: memref<1x128xf32, #tpu.memory_space<vmem>>, %arg5: memref<1x128xf32, #tpu.memory_space<vmem>>, %arg6: memref<16x2x8x128xf32, #tpu.memory_space<vmem>>) attributes {dimension_semantics = [#tpu.dimension_semantics<parallel>], iteration_bounds = array<i64: 1>, scalar_prefetch = 0 : i64, scratch_operands = 0 : i64, tpu.core_type = #tpu.core_type<tc>, window_params = [{transform_indices = @transform_0, window_bounds = array<i64: 128, 128>}, {pipeline_mode = #tpu.pipeline_mode<synchronous>, transform_indices = @transform_1, window_bounds = array<i64: 128, 256>}, {pipeline_mode = #tpu.pipeline_mode<synchronous>, transform_indices = @transform_2, window_bounds = array<i64: 128, 128>}, {pipeline_mode = #tpu.pipeline_mode<synchronous>, transform_indices = @transform_3, window_bounds = array<i64: 1, 128>}, {pipeline_mode = #tpu.pipeline_mode<synchronous>, transform_indices = @transform_4, window_bounds = array<i64: 1, 128>}, {transform_indices = @transform_5, window_bounds = array<i64: 16, 2, 8, 128>}]} {
    %c0 = arith.constant 0 : index
    %c0_0 = arith.constant 0 : index
    %0 = vector.load %arg1[%c0, %c0_0] : memref<128x128xf32, #tpu.memory_space<vmem>>, vector<128x128xf32>
    %c0_1 = arith.constant 0 : index
    %c0_2 = arith.constant 0 : index
    %1 = vector.load %arg3[%c0_1, %c0_2] : memref<128x128xf32, #tpu.memory_space<vmem>>, vector<128x128xf32>
    %c0_3 = arith.constant 0 : index
    %c0_4 = arith.constant 0 : index
    %2 = vector.load %arg4[%c0_3, %c0_4] : memref<1x128xf32, #tpu.memory_space<vmem>>, vector<1x128xf32>
    %c0_5 = arith.constant 0 : index
    %c0_6 = arith.constant 0 : index
    %3 = vector.load %arg5[%c0_5, %c0_6] : memref<1x128xf32, #tpu.memory_space<vmem>>, vector<1x128xf32>
    %c0_7 = arith.constant 0 : index
    %c0_8 = arith.constant 0 : index
    %4 = vector.load %arg2[%c0_7, %c0_8] : memref<128x256xf32, #tpu.memory_space<vmem>>, vector<128x128xf32>
    %cst = arith.constant dense<0.000000e+00> : vector<128x128xf32>
    %5 = tpu.matmul %0, %4, %cst {dimension_numbers = #tpu.dot_dimension_numbers<[1], [0], [0], [1], [0, 0, 1, 1], [], []>} : vector<128x128xf32>, vector<128x128xf32>, vector<128x128xf32> -> vector<128x128xf32>
    %cst_9 = arith.constant dense<0.000000e+00> : vector<128x128xf32>
    %6 = tpu.matmul %5, %1, %cst_9 {dimension_numbers = #tpu.dot_dimension_numbers<[1], [0], [0], [1], [0, 0, 1, 1], [], []>} : vector<128x128xf32>, vector<128x128xf32>, vector<128x128xf32> -> vector<128x128xf32>
    %cst_10 = arith.constant 1.562500e-02 : f32
    %7 = vector.broadcast %cst_10 : f32 to vector<128x128xf32>
    %8 = arith.mulf %6, %7 : vector<128x128xf32>
    %9 = arith.subf %5, %8 : vector<128x128xf32>
    %10 = arith.mulf %9, %9 : vector<128x128xf32>
    %cst_11 = arith.constant dense<0.000000e+00> : vector<128x128xf32>
    %11 = tpu.matmul %10, %1, %cst_11 {dimension_numbers = #tpu.dot_dimension_numbers<[1], [0], [0], [1], [0, 0, 1, 1], [], []>} : vector<128x128xf32>, vector<128x128xf32>, vector<128x128xf32> -> vector<128x128xf32>
    %cst_12 = arith.constant 1.562500e-02 : f32
    %12 = vector.broadcast %cst_12 : f32 to vector<128x128xf32>
    %13 = arith.mulf %11, %12 : vector<128x128xf32>
    %cst_13 = arith.constant 9.99999974E-6 : f32
    %14 = vector.broadcast %cst_13 : f32 to vector<128x128xf32>
    %15 = arith.addf %13, %14 : vector<128x128xf32>
    %16 = math.rsqrt %15 : vector<128x128xf32>
    %17 = arith.mulf %9, %16 : vector<128x128xf32>
    %18 = vector.broadcast %2 : vector<1x128xf32> to vector<128x128xf32>
    %19 = arith.mulf %17, %18 : vector<128x128xf32>
    %20 = vector.broadcast %3 : vector<1x128xf32> to vector<128x128xf32>
    %21 = arith.addf %19, %20 : vector<128x128xf32>
    %22 = vector.shape_cast %21 : vector<128x128xf32> to vector<16x8x128xf32>
    %c0_14 = arith.constant 0 : index
    %c0_15 = arith.constant 0 : index
    %c0_16 = arith.constant 0 : index
    %c0_17 = arith.constant 0 : index
    %23 = vector.load %arg6[%c0_14, %c0_15, %c0_16, %c0_17] : memref<16x2x8x128xf32, #tpu.memory_space<vmem>>, vector<16x1x8x128xf32>
    %24 = vector.shape_cast %23 : vector<16x1x8x128xf32> to vector<16x8x128xf32>
    %25 = vector.shape_cast %22 : vector<16x8x128xf32> to vector<16x1x8x128xf32>
    tpu.vector_store %arg6[%c0_14, %c0_15, %c0_16, %c0_17], %25 {strides = array<i32>} : memref<16x2x8x128xf32, #tpu.memory_space<vmem>>, vector<16x1x8x128xf32>,
    %c0_18 = arith.constant 0 : index
    %c128 = arith.constant 128 : index
    %26 = vector.load %arg2[%c0_18, %c128] : memref<128x256xf32, #tpu.memory_space<vmem>>, vector<128x128xf32>
    %cst_19 = arith.constant dense<0.000000e+00> : vector<128x128xf32>
    %27 = tpu.matmul %0, %26, %cst_19 {dimension_numbers = #tpu.dot_dimension_numbers<[1], [0], [0], [1], [0, 0, 1, 1], [], []>} : vector<128x128xf32>, vector<128x128xf32>, vector<128x128xf32> -> vector<128x128xf32>
    %cst_20 = arith.constant dense<0.000000e+00> : vector<128x128xf32>
    %28 = tpu.matmul %27, %1, %cst_20 {dimension_numbers = #tpu.dot_dimension_numbers<[1], [0], [0], [1], [0, 0, 1, 1], [], []>} : vector<128x128xf32>, vector<128x128xf32>, vector<128x128xf32> -> vector<128x128xf32>
    %cst_21 = arith.constant 1.562500e-02 : f32
    %29 = vector.broadcast %cst_21 : f32 to vector<128x128xf32>
    %30 = arith.mulf %28, %29 : vector<128x128xf32>
    %31 = arith.subf %27, %30 : vector<128x128xf32>
    %32 = arith.mulf %31, %31 : vector<128x128xf32>
    %cst_22 = arith.constant dense<0.000000e+00> : vector<128x128xf32>
    %33 = tpu.matmul %32, %1, %cst_22 {dimension_numbers = #tpu.dot_dimension_numbers<[1], [0], [0], [1], [0, 0, 1, 1], [], []>} : vector<128x128xf32>, vector<128x128xf32>, vector<128x128xf32> -> vector<128x128xf32>
    %cst_23 = arith.constant 1.562500e-02 : f32
    %34 = vector.broadcast %cst_23 : f32 to vector<128x128xf32>
    %35 = arith.mulf %33, %34 : vector<128x128xf32>
    %cst_24 = arith.constant 9.99999974E-6 : f32
    %36 = vector.broadcast %cst_24 : f32 to vector<128x128xf32>
    %37 = arith.addf %35, %36 : vector<128x128xf32>
    %38 = math.rsqrt %37 : vector<128x128xf32>
    %39 = arith.mulf %31, %38 : vector<128x128xf32>
    %40 = vector.broadcast %2 : vector<1x128xf32> to vector<128x128xf32>
    %41 = arith.mulf %39, %40 : vector<128x128xf32>
    %42 = vector.broadcast %3 : vector<1x128xf32> to vector<128x128xf32>
    %43 = arith.addf %41, %42 : vector<128x128xf32>
    %44 = vector.shape_cast %43 : vector<128x128xf32> to vector<16x8x128xf32>
    %c0_25 = arith.constant 0 : index
    %c1 = arith.constant 1 : index
    %c0_26 = arith.constant 0 : index
    %c0_27 = arith.constant 0 : index
    %45 = vector.load %arg6[%c0_25, %c1, %c0_26, %c0_27] : memref<16x2x8x128xf32, #tpu.memory_space<vmem>>, vector<16x1x8x128xf32>
    %46 = vector.shape_cast %45 : vector<16x1x8x128xf32> to vector<16x8x128xf32>
    %47 = vector.shape_cast %44 : vector<16x8x128xf32> to vector<16x1x8x128xf32>
    tpu.vector_store %arg6[%c0_25, %c1, %c0_26, %c0_27], %47 {strides = array<i32>} : memref<16x2x8x128xf32, #tpu.memory_space<vmem>>, vector<16x1x8x128xf32>,
    return
  }
  func.func @transform_0(%arg0: i32) -> (i32, i32) {
    %c0_i32 = arith.constant 0 : i32
    %c0_i32_0 = arith.constant 0 : i32
    return %arg0, %c0_i32 : i32, i32
  }
  func.func @transform_1(%arg0: i32) -> (i32, i32) {
    %c0_i32 = arith.constant 0 : i32
    %c0_i32_0 = arith.constant 0 : i32
    %c0_i32_1 = arith.constant 0 : i32
    return %c0_i32, %c0_i32_0 : i32, i32
  }
  func.func @transform_2(%arg0: i32) -> (i32, i32) {
    %c0_i32 = arith.constant 0 : i32
    %c0_i32_0 = arith.constant 0 : i32
    %c0_i32_1 = arith.constant 0 : i32
    return %c0_i32, %c0_i32_0 : i32, i32
  }
  func.func @transform_3(%arg0: i32) -> (i32, i32) {
    %c0_i32 = arith.constant 0 : i32
    %c0_i32_0 = arith.constant 0 : i32
    %c0_i32_1 = arith.constant 0 : i32
    return %c0_i32, %c0_i32_0 : i32, i32
  }
  func.func @transform_4(%arg0: i32) -> (i32, i32) {
    %c0_i32 = arith.constant 0 : i32
    %c0_i32_0 = arith.constant 0 : i32
    %c0_i32_1 = arith.constant 0 : i32
    return %c0_i32, %c0_i32_0 : i32, i32
  }
  func.func @transform_5(%arg0: i32) -> (i32, i32, i32, i32) {
    %c0_i32 = arith.constant 0 : i32
    %c0_i32_0 = arith.constant 0 : i32
    %c0_i32_1 = arith.constant 0 : i32
    %c0_i32_2 = arith.constant 0 : i32
    return %arg0, %c0_i32, %c0_i32_0, %c0_i32_1 : i32, i32, i32, i32
  }
}

</mosaic_0001>

<bundles_post_ra>
// kernel: tpu_custom_call.1
= control target key start
LH: loop header
LB: loop body
LE: loop exit
PB: predicated region body
PF: predicated region fallthrough
CT: control target
= control target key end

     0   :  { %10 = vsyncpa [#allocation3], 0  ;;  %s2930_s0 = inlined_call_operand.hbm [shape: f32[128,128], index: 0, kind: input, shape index: {}]   ;;  %s2931_s1 = inlined_call_operand.hbm [shape: f32[128,256], index: 1, kind: input, shape index: {}]   ;;  %s2932_s2 = inlined_call_operand.hbm [shape: f32[128,128], index: 2, kind: input, shape index: {}]   ;;  %s2933_s3 = inlined_call_operand.hbm [shape: f32[1,128], index: 3, kind: input, shape index: {}]   ;;  %s2934_s4 = inlined_call_operand.hbm [shape: f32[1,128], index: 4, kind: input, shape index: {}]   ;;  %s2935_s5 = inlined_call_operand.hbm [shape: f32[16,2,8,128], index: 5, kind: output, shape index: {}]  }
   0x1   :  { %11 = vsyncpa [#allocation6], 0 }
   0x2   :  { %12 = vsyncpa [#allocation9], 0 }
   0x3   :  { %13 = vsyncpa [#allocation4], 0  ;;  %s2309_s18 = smov [#allocation5]   ;;  %s2169_s22 = scalar_lea.hbm %s2931_s1, 4096 }
   0x4   :  { %s31_s19 = sshll.u32 %s2309_s18, 4  ;;  %p2170_p0 = scmp.ne.s32.totalorder %s2931_s1, %s2169_s22  ;;  %s32_s19 = int_to_ptr.vmem [resolvable:$true] %s31_s19 }
   0x5   :  { %p2173_p1 = scmp.lt.u32.totalorder %s2169_s22, %s2931_s1 }
   0x7   :  { %p2175_p2 = pnand %p2173_p1, %p2170_p0 }
   0x9   :  { %2178 = shalt.err (!%p2175_p2)
}
   0xa   :  { %s2179_s27 = scalar_lea.vmem %s32_s19, 4096  ;;  %p2184_p4 = scmp.lt.s32.totalorder %s32_s19, %s32_s19 }
   0xb   :  { %p2180_p3 = scmp.ne.s32.totalorder %s32_s19, %s2179_s27  ;;  %p2185_p5 = scmp.lt.s32.totalorder %s2179_s27, %s2179_s27 }
   0xd   :  { %p2186_p6 = por %p2185_p5, %p2184_p4 }
   0xf   :  { %p2187_p7 = pnand %p2186_p6, %p2180_p3 }
  0x11   :  { %2190 = shalt.err (!%p2187_p7)
}
  0x12   :  { %s2310_s28 = smov 256   ;;  %s2311_s29 = smov 16  }
  0x13   :  { %37 = dma.hbm_to_vmem [thread:$0]  %s2931_s1, 4096, %s32_s19, [#allocation6], %s2310_s28, %s2310_s28, %s2311_s29  }
  0x14   :  { %s2312_s7 = smov [#allocation8]   ;;  %s2313_s9 = smov [#allocation2]  }
  0x15   :  { %s56_s8 = sshll.u32 %s2312_s7, 4  ;;  %s19_s10 = sshll.u32 %s2313_s9, 4  ;;  %s57_s8 = int_to_ptr.vmem [resolvable:$true] %s56_s8  ;;  %s20_s10 = int_to_ptr.vmem [resolvable:$true] %s19_s10 }
  0x16   :  { %s2191_s13 = scalar_lea.hbm %s2933_s3, 16 }
  0x17   :  { %p2192_p8 = scmp.ne.s32.totalorder %s2933_s3, %s2191_s13  ;;  %p2195_p9 = scmp.lt.u32.totalorder %s2191_s13, %s2933_s3 }
  0x19   :  { %p2197_p10 = pnand %p2195_p9, %p2192_p8 }
  0x1b   :  { %2200 = shalt.err (!%p2197_p10)
}
  0x1c   :  { %s2201_s1 = scalar_lea.vmem %s57_s8, 16  ;;  %s2205_s18 = scalar_lea.vmem %s57_s8, 32 }
  0x1d   :  { %p2202_p11 = scmp.ne.s32.totalorder %s57_s8, %s2201_s1  ;;  %p2206_p12 = scmp.lt.s32.totalorder %s57_s8, %s57_s8 }
  0x1e   :  { %p2207_p13 = scmp.lt.s32.totalorder %s2205_s18, %s2201_s1 }
  0x20   :  { %p2208_p0 = por %p2207_p13, %p2206_p12 }
  0x22   :  { %p2209_p1 = pnand %p2208_p0, %p2202_p11 }
  0x24   :  { %2212 = shalt.err (!%p2209_p1)
}
  0x25   :  { %59 = dma.hbm_to_vmem [thread:$0]  %s2933_s3, 16, %s57_s8, [#allocation9]  }
  0x26   :  { %s2213_s23 = scalar_lea.hbm %s2930_s0, 2048 }
  0x27   :  { %p2214_p2 = scmp.ne.s32.totalorder %s2930_s0, %s2213_s23  ;;  %p2217_p3 = scmp.lt.u32.totalorder %s2213_s23, %s2930_s0 }
  0x29   :  { %p2219_p4 = pnand %p2217_p3, %p2214_p2 }
  0x2b   :  { %2222 = shalt.err (!%p2219_p4)
}
  0x2c   :  { %s2223_s28 = scalar_lea.vmem %s20_s10, 2048  ;;  %p2228_p6 = scmp.lt.s32.totalorder %s20_s10, %s20_s10 }
  0x2d   :  { %p2224_p5 = scmp.ne.s32.totalorder %s20_s10, %s2223_s28  ;;  %p2229_p7 = scmp.lt.s32.totalorder %s2223_s28, %s2223_s28 }
  0x2f   :  { %p2230_p8 = por %p2229_p7, %p2228_p6 }
  0x31   :  { %p2231_p9 = pnand %p2230_p8, %p2224_p5 }
  0x33   :  { %2234 = shalt.err (!%p2231_p9)
}
  0x34   :  { %s2314_s3 = smov 128   ;;  %s2315_s29 = smov 8  }
  0x35   :  { %25 = dma.hbm_to_vmem [thread:$0]  %s2930_s0, 2048, %s20_s10, [#allocation3], %s2314_s3, %s2314_s3, %s2315_s29  }
  0x36   :  { %s2316_s7 = smov [#allocation7]   ;;  %s2317_s9 = smov [#allocation10]  }
  0x37   :  { %s43_s8 = sshll.u32 %s2316_s7, 4  ;;  %s66_s11 = sshll.u32 %s2317_s9, 4  ;;  %s44_s8 = int_to_ptr.vmem [resolvable:$true] %s43_s8  ;;  %s67_s11 = int_to_ptr.vmem [resolvable:$true] %s66_s11 }
  0x38   :  { %s2235_s14 = scalar_lea.hbm %s2932_s2, 2048 }
  0x39   :  { %p2236_p10 = scmp.ne.s32.totalorder %s2932_s2, %s2235_s14  ;;  %p2239_p11 = scmp.lt.u32.totalorder %s2235_s14, %s2932_s2 }
  0x3b   :  { %p2241_p12 = pnand %p2239_p11, %p2236_p10 }
  0x3d   :  { %2244 = shalt.err (!%p2241_p12)
}
  0x3e   :  { %s2245_s0 = scalar_lea.vmem %s44_s8, 2048  ;;  %p2250_p0 = scmp.lt.s32.totalorder %s44_s8, %s44_s8 }
  0x3f   :  { %p2246_p13 = scmp.ne.s32.totalorder %s44_s8, %s2245_s0  ;;  %p2251_p1 = scmp.lt.s32.totalorder %s2245_s0, %s2245_s0 }
  0x41   :  { %p2252_p2 = por %p2251_p1, %p2250_p0 }
  0x43   :  { %p2253_p3 = pnand %p2252_p2, %p2246_p13 }
  0x45   :  { %2256 = shalt.err (!%p2253_p3)
}
  0x46   :  { %49 = dma.hbm_to_vmem [thread:$0]  %s2932_s2, 2048, %s44_s8, [#allocation6], %s2314_s3, %s2314_s3, %s2315_s29  }
  0x47   :  { %s2257_s21 = scalar_lea.hbm %s2934_s4, 16 }
  0x48   :  { %p2258_p4 = scmp.ne.s32.totalorder %s2934_s4, %s2257_s21  ;;  %p2261_p5 = scmp.lt.u32.totalorder %s2257_s21, %s2934_s4 }
  0x4a   :  { %p2263_p6 = pnand %p2261_p5, %p2258_p4 }
  0x4c   :  { %2266 = shalt.err (!%p2263_p6)
}
  0x4d   :  { %s2267_s26 = scalar_lea.vmem %s67_s11, 16  ;;  %s2271_s27 = scalar_lea.vmem %s67_s11, 32 }
  0x4e   :  { %p2268_p7 = scmp.ne.s32.totalorder %s67_s11, %s2267_s26  ;;  %p2272_p8 = scmp.lt.s32.totalorder %s67_s11, %s67_s11 }
  0x4f   :  { %p2273_p9 = scmp.lt.s32.totalorder %s2271_s27, %s2267_s26 }
  0x51   :  { %p2274_p10 = por %p2273_p9, %p2272_p8 }
  0x53   :  { %p2275_p11 = pnand %p2274_p10, %p2268_p7 }
  0x55   :  { %2278 = shalt.err (!%p2275_p11)
}
  0x56   :  { %69 = dma.hbm_to_vmem [thread:$0]  %s2934_s4, 16, %s67_s11, [#allocation9]  }
  0x57   :  { %2301 = dma.done.wait [#allocation3], 2048  }
  0x58   :  { %2302 = vsyncadd [#allocation3], 4294965248 }
  0x59   :  { %2303 = dma.done.wait [#allocation6], 6144  }
  0x5a   :  { %2304 = vsyncadd [#allocation6], 4294961152 }
  0x5b   :  { %2305 = dma.done.wait [#allocation9], 32  }
  0x5c   :  { %2306 = vsyncadd [#allocation9], 4294967264  ;;  %v119_v0 = vld [vmem:[#allocation5] sm:$0xff]  ;;  %v120_v1 = vld [vmem:[#allocation5 + $0x10] sm:$0xff]  ;;  %s2318_s4 = smov [#allocation11]  }
  0x5d   :  { %v121_v2 = vld [vmem:[#allocation5 + $0x20] sm:$0xff]  ;;  %v1903_v3 = vpack.c.bf16 %v120_v1, %v119_v0  ;;  %v122_v4 = vld [vmem:[#allocation5 + $0x30] sm:$0xff]  ;;  %v102_v16 = vld [vmem:[#allocation7 + $0x8] sm:$0xff]  ;;  %s1359_s30 = sshll.u32 %s2318_s4, 4  ;;  %s1360_s30 = int_to_ptr.vmem [resolvable:$true] %s1359_s30 }
  0x5e   :  { %v1907_v5 = vpack.c.bf16 %v122_v4, %v121_v2  ;;  %v123_v6 = vld [vmem:[#allocation5 + $0x40] sm:$0xff]  ;;  %v124_v7 = vld [vmem:[#allocation5 + $0x50] sm:$0xff]  ;;  %v104_v18 = vld [vmem:[#allocation7 + $0x18] sm:$0xff]  ;;  %s2279_s6 = scalar_lea.vmem %s1360_s30, 4096  ;;  %p2284_p13 = scmp.lt.s32.totalorder %s1360_s30, %s1360_s30 }
  0x5f   :  { %1904 = vmatprep.subr.bf16.mxu0 %v1903_v3  ;;  %v1911_v8 = vpack.c.bf16 %v124_v7, %v123_v6  ;;  %v2415_v9 = vld [vmem:[#allocation2] sm:$0xff]  ;;  %v126_v11 = vld [vmem:[#allocation5 + $0x70] sm:$0xff]  ;;  %v106_v23 = vld [vmem:[#allocation7 + $0x28] sm:$0xff]  ;;  %p2280_p12 = scmp.ne.s32.totalorder %s1360_s30, %s2279_s6  ;;  %p2285_p0 = scmp.lt.s32.totalorder %s2279_s6, %s2279_s6 }
  0x60   :  { %1906 = vmatpush3.bf16.msra.mxu0 %v1903_v3  ;;  %v125_v10 = vld [vmem:[#allocation5 + $0x60] sm:$0xff]  ;;  %1599 = vmatprep.mubr.f32.mxu0 %v2415_v9  ;;  %v128_v14 = vld [vmem:[#allocation5 + $0x90] sm:$0xff]  ;;  %v108_v29 = vld [vmem:[#allocation7 + $0x38] sm:$0xff] }
  0x61   :  { %1908 = vmatprep.subr.bf16.mxu0 %v1907_v5  ;;  %v1915_v12 = vpack.c.bf16 %v126_v11, %v125_v10  ;;  %v127_v13 = vld [vmem:[#allocation5 + $0x80] sm:$0xff]  ;;  %v103_v17 = vld [vmem:[#allocation7 + $0x10] sm:$0xff]  ;;  %v110_v35 = vld [vmem:[#allocation7 + $0x48] sm:$0xff]  ;;  %p2286_p1 = por %p2285_p0, %p2284_p13 }
  0x62   :  { %v101_v15 = vld [vmem:[#allocation7] sm:$0xff]  ;;  %v2420_v20 = vpack.c.bf16 %v104_v18, %v103_v17  ;;  %v1919_v21 = vpack.c.bf16 %v128_v14, %v127_v13  ;;  %v130_v25 = vld [vmem:[#allocation5 + $0xb0] sm:$0xff]  ;;  %v112_v41 = vld [vmem:[#allocation7 + $0x58] sm:$0xff] }
  0x63   :  { %v2418_v19 = vpack.c.bf16 %v102_v16, %v101_v15  ;;  %v105_v22 = vld [vmem:[#allocation7 + $0x20] sm:$0xff]  ;;  %v107_v28 = vld [vmem:[#allocation7 + $0x30] sm:$0xff]  ;;  %v114_v44 = vld [vmem:[#allocation7 + $0x68] sm:$0xff]  ;;  %p2287_p2 = pnand %p2286_p1, %p2280_p12 }
  0x64   :  { %1910 = vmatpush3.bf16.msra.mxu0 %v1907_v5  ;;  %v129_v24 = vld [vmem:[#allocation5 + $0xa0] sm:$0xff]  ;;  %v2425_v26 = vpack.c.bf16 %v106_v23, %v105_v22  ;;  %v132_v31 = vld [vmem:[#allocation5 + $0xd0] sm:$0xff]  ;;  %v2429_v32 = vpack.c.bf16 %v108_v29, %v107_v28  ;;  %v2440_v45 = vld [vmem:[#allocation2 + $0x8] sm:$0xff] }
  0x65   :  { %1912 = vmatprep.subr.bf16.mxu0 %v1911_v8  ;;  %1936 = vmatprep.subr.bf16.mxu1 %v2418_v19  ;;  %v1923_v27 = vpack.c.bf16 %v130_v25, %v129_v24  ;;  %v131_v30 = vld [vmem:[#allocation5 + $0xc0] sm:$0xff]  ;;  %v134_v37 = vld [vmem:[#allocation5 + $0xf0] sm:$0xff]  ;;  %v116_v49 = vld [vmem:[#allocation7 + $0x78] sm:$0xff] }
  0x66   :  { %1938 = vmatpush3.bf16.msra.mxu1 %v2418_v19  ;;  %v1927_v33 = vpack.c.bf16 %v132_v31, %v131_v30  ;;  %v109_v34 = vld [vmem:[#allocation7 + $0x40] sm:$0xff]  ;;  %v111_v40 = vld [vmem:[#allocation7 + $0x50] sm:$0xff]  ;;  %v2451_v50 = vld [vmem:[#allocation2 + $0x18] sm:$0xff] }
  0x67   :  { %1940 = vmatprep.subr.bf16.mxu1 %v2420_v20  ;;  %v133_v36 = vld [vmem:[#allocation5 + $0xe0] sm:$0xff]  ;;  %v2433_v38 = vpack.c.bf16 %v110_v35, %v109_v34  ;;  %v2437_v42 = vpack.c.bf16 %v112_v41, %v111_v40  ;;  %v2445_v47 = vld [vmem:[#allocation2 + $0x10] sm:$0xff]  ;;  %v2463_v53 = vld [vmem:[#allocation2 + $0x28] sm:$0xff] }
  0x68   :  { %1914 = vmatpush3.bf16.msra.mxu0 %v1911_v8  ;;  %v1931_v39 = vpack.c.bf16 %v134_v37, %v133_v36  ;;  %v113_v43 = vld [vmem:[#allocation7 + $0x60] sm:$0xff]  ;;  %v115_v48 = vld [vmem:[#allocation7 + $0x70] sm:$0xff]  ;;  %v2473_v55 = vld [vmem:[#allocation2 + $0x38] sm:$0xff] }
  0x69   :  { %1916 = vmatprep.subr.bf16.mxu0 %v1915_v12  ;;  %v2443_v46 = vpack.c.bf16 %v114_v44, %v113_v43  ;;  %v2454_v51 = vpack.c.bf16 %v116_v49, %v115_v48  ;;  %v2456_v52 = vld [vmem:[#allocation2 + $0x20] sm:$0xff]  ;;  %v2466_v54 = vld [vmem:[#allocation2 + $0x30] sm:$0xff]  ;;  %v2481_v57 = vld [vmem:[#allocation2 + $0x48] sm:$0xff] }
  0x6a   :  { %1942 = vmatpush3.bf16.msra.mxu1 %v2420_v20  ;;  %v2475_v56 = vld [vmem:[#allocation2 + $0x40] sm:$0xff]  ;;  %v2483_v58 = vld [vmem:[#allocation2 + $0x50] sm:$0xff]  ;;  %v2489_v59 = vld [vmem:[#allocation2 + $0x58] sm:$0xff] }
  0x6b   :  { %1944 = vmatprep.subr.bf16.mxu1 %v2425_v26  ;;  %v2491_v60 = vld [vmem:[#allocation2 + $0x60] sm:$0xff]  ;;  %v2497_v61 = vld [vmem:[#allocation2 + $0x68] sm:$0xff]  ;;  %v2499_v62 = vld [vmem:[#allocation2 + $0x70] sm:$0xff] }
  0x6c   :  { %1918 = vmatpush3.bf16.msra.mxu0 %v1915_v12  ;;  %v2505_v63 = vld [vmem:[#allocation2 + $0x78] sm:$0xff]  ;;  %v742_v0 = vld [vmem:[#allocation5 + $0x8] sm:$0xff] }
  0x6d   :  { %1920 = vmatprep.subr.bf16.mxu0 %v1919_v21  ;;  %v743_v1 = vld [vmem:[#allocation5 + $0x18] sm:$0xff]  ;;  %v744_v3 = vld [vmem:[#allocation5 + $0x28] sm:$0xff] }
  0x6e   :  { %1946 = vmatpush3.bf16.msra.mxu1 %v2425_v26  ;;  %v1999_v2 = vpack.c.bf16 %v743_v1, %v742_v0  ;;  %v745_v4 = vld [vmem:[#allocation5 + $0x38] sm:$0xff]  ;;  %v746_v8 = vld [vmem:[#allocation5 + $0x48] sm:$0xff] }
  0x6f   :  { %1948 = vmatprep.subr.bf16.mxu1 %v2429_v32  ;;  %v2003_v7 = vpack.c.bf16 %v745_v4, %v744_v3  ;;  %v747_v10 = vld [vmem:[#allocation5 + $0x58] sm:$0xff]  ;;  %v748_v14 = vld [vmem:[#allocation5 + $0x68] sm:$0xff] }
  0x70   :  { %1922 = vmatpush3.bf16.msra.mxu0 %v1919_v21  ;;  %v2007_v13 = vpack.c.bf16 %v747_v10, %v746_v8  ;;  %v749_v15 = vld [vmem:[#allocation5 + $0x78] sm:$0xff]  ;;  %v750_v21 = vld [vmem:[#allocation5 + $0x88] sm:$0xff] }
  0x71   :  { %1924 = vmatprep.subr.bf16.mxu0 %v1923_v27  ;;  %v2011_v18 = vpack.c.bf16 %v749_v15, %v748_v14  ;;  %v751_v22 = vld [vmem:[#allocation5 + $0x98] sm:$0xff] }
  0x72   :  { %1950 = vmatpush3.bf16.msra.mxu1 %v2429_v32  ;;  %v2015_v25 = vpack.c.bf16 %v751_v22, %v750_v21  ;;  %v753_v28 = vld [vmem:[#allocation5 + $0xb8] sm:$0xff] }
  0x73   :  { %1952 = vmatprep.subr.bf16.mxu1 %v2433_v38  ;;  %v755_v34 = vld [vmem:[#allocation5 + $0xd8] sm:$0xff] }
  0x74   :  { %1926 = vmatpush3.bf16.msra.mxu0 %v1923_v27  ;;  %v752_v27 = vld [vmem:[#allocation5 + $0xa8] sm:$0xff]  ;;  %v757_v40 = vld [vmem:[#allocation5 + $0xf8] sm:$0xff] }
  0x75   :  { %1928 = vmatprep.subr.bf16.mxu0 %v1927_v33  ;;  %v2019_v31 = vpack.c.bf16 %v753_v28, %v752_v27 }
  0x76   :  { %1954 = vmatpush3.bf16.msra.mxu1 %v2433_v38 }
  0x77   :  { %1956 = vmatprep.subr.bf16.mxu1 %v2437_v42 }
  0x78   :  { %1930 = vmatpush3.bf16.msra.mxu0 %v1927_v33  ;;  %v754_v33 = vld [vmem:[#allocation5 + $0xc8] sm:$0xff] }
  0x79   :  { %1932 = vmatprep.subr.bf16.mxu0 %v1931_v39  ;;  %v2023_v37 = vpack.c.bf16 %v755_v34, %v754_v33 }
  0x7a   :  { %1958 = vmatpush3.bf16.msra.mxu1 %v2437_v42 }
  0x7b   :  { %1960 = vmatprep.subr.bf16.mxu1 %v2443_v46 }
  0x7c   :  { %1934 = vmatpush3.bf16.msra.mxu0 %v1931_v39  ;;  %v756_v39 = vld [vmem:[#allocation5 + $0xe8] sm:$0xff] }
  0x7d   :  { %1968 = vmatprep.subr.bf16.mxu0 %v2418_v19  ;;  %v2027_v44 = vpack.c.bf16 %v757_v40, %v756_v39 }
  0x7e   :  { %1962 = vmatpush3.bf16.msra.mxu1 %v2443_v46 }
  0x7f   :  { %1600 = vmatmul.mubr.f32.vlgmr.msra.gmra.mrb[0].mxu0 %v2440_v45  ;;  %1964 = vmatprep.subr.bf16.mxu1 %v2454_v51 }
  0x80   :  { %1602 = vmatprep.mubr.f32.mxu0 %v2445_v47  ;;  %1970 = vmatpush3.bf16.msra.mxu0 %v2418_v19 }
  0x81   :  { %1972 = vmatprep.subr.bf16.mxu0 %v2420_v20 }
  0x82   :  { %1966 = vmatpush3.bf16.msra.mxu1 %v2454_v51 }
  0x83   :  { %1603 = vmatmul.mubr.f32.gmra.mrb[2].mxu0 %v2451_v50  ;;  %2000 = vmatprep.subr.bf16.mxu1 %v1999_v2 }
  0x84   :  { %1605 = vmatprep.mubr.f32.mxu0 %v2456_v52  ;;  %1974 = vmatpush3.bf16.msra.mxu0 %v2420_v20 }
  0x85   :  { %1976 = vmatprep.subr.bf16.mxu0 %v2425_v26 }
  0x87   :  { %1606 = vmatmul.mubr.f32.gmra.mrb[4].mxu0 %v2463_v53 }
  0x88   :  { %1608 = vmatprep.mubr.f32.mxu0 %v2466_v54  ;;  %1978 = vmatpush3.bf16.msra.mxu0 %v2425_v26 }
  0x89   :  { %1980 = vmatprep.subr.bf16.mxu0 %v2429_v32 }
  0x8b   :  { %1609 = vmatmul.mubr.f32.gmra.mrb[6].mxu0 %v2473_v55 }
  0x8c   :  { %1611 = vmatprep.mubr.f32.mxu0 %v2475_v56  ;;  %1982 = vmatpush3.bf16.msra.mxu0 %v2429_v32 }
  0x8d   :  { %1984 = vmatprep.subr.bf16.mxu0 %v2433_v38 }
  0x8f   :  { %1612 = vmatmul.mubr.f32.gmra.mrb[8].mxu0 %v2481_v57 }
  0x90   :  { %1614 = vmatprep.mubr.f32.mxu0 %v2483_v58  ;;  %1986 = vmatpush3.bf16.msra.mxu0 %v2433_v38 }
  0x91   :  { %1988 = vmatprep.subr.bf16.mxu0 %v2437_v42 }
  0x93   :  { %1615 = vmatmul.mubr.f32.gmra.mrb[10].mxu0 %v2489_v59 }
  0x94   :  { %1617 = vmatprep.mubr.f32.mxu0 %v2491_v60  ;;  %1990 = vmatpush3.bf16.msra.mxu0 %v2437_v42 }
  0x95   :  { %1992 = vmatprep.subr.bf16.mxu0 %v2443_v46 }
  0x97   :  { %1618 = vmatmul.mubr.f32.gmra.mrb[12].mxu0 %v2497_v61 }
  0x98   :  { %1620 = vmatprep.mubr.f32.mxu0 %v2499_v62  ;;  %1994 = vmatpush3.bf16.msra.mxu0 %v2443_v46 }
  0x99   :  { %1996 = vmatprep.subr.bf16.mxu0 %v2454_v51 }
  0x9b   :  { %1621 = vmatmul.mubr.f32.gmra.mrb[14].mxu0 %v2505_v63 }
  0x9c   :  { %1998 = vmatpush3.bf16.msra.mxu0 %v2454_v51 }
  0x9d   :  { %2032 = vmatprep.subr.bf16.mxu0 %v2418_v19 }
 0x152   :  { %v2512_v5 = vpop.f32.mrb[0].mxu0 }
 0x153   :  { %v2514_v6 = vpop.f32.mrb[1].mxu0 }
 0x154   :  { %1655 = vmatprep.mubr.f32.mxu1 %v2514_v6 }
 0x155   :  { %1656 = vmatmul.mubr.f32.vlgmr.msra.gmra.mrb[0].mxu1 %v2512_v5 }
 0x156   :  { %v2518_v11 = vpop.f32.mrb[2].mxu0  ;;  %2002 = vmatpush3.bf16.msra.mxu1 %v1999_v2 }
 0x157   :  { %v2520_v12 = vpop.f32.mrb[3].mxu0  ;;  %2004 = vmatprep.subr.bf16.mxu1 %v2003_v7 }
 0x158   :  { %1658 = vmatprep.mubr.f32.mxu1 %v2520_v12 }
 0x159   :  { %1659 = vmatmul.mubr.f32.gmra.mrb[2].mxu1 %v2518_v11 }
 0x15a   :  { %v2524_v16 = vpop.f32.mrb[4].mxu0  ;;  %2006 = vmatpush3.bf16.msra.mxu1 %v2003_v7 }
 0x15b   :  { %v2526_v17 = vpop.f32.mrb[5].mxu0  ;;  %2008 = vmatprep.subr.bf16.mxu1 %v2007_v13 }
 0x15c   :  { %1661 = vmatprep.mubr.f32.mxu1 %v2526_v17 }
 0x15d   :  { %1662 = vmatmul.mubr.f32.gmra.mrb[4].mxu1 %v2524_v16 }
 0x15e   :  { %v2530_v23 = vpop.f32.mrb[6].mxu0  ;;  %2010 = vmatpush3.bf16.msra.mxu1 %v2007_v13 }
 0x15f   :  { %v2532_v24 = vpop.f32.mrb[7].mxu0  ;;  %2012 = vmatprep.subr.bf16.mxu1 %v2011_v18 }
 0x160   :  { %1664 = vmatprep.mubr.f32.mxu1 %v2532_v24 }
 0x161   :  { %1665 = vmatmul.mubr.f32.gmra.mrb[6].mxu1 %v2530_v23 }
 0x162   :  { %v2536_v29 = vpop.f32.mrb[8].mxu0  ;;  %2014 = vmatpush3.bf16.msra.mxu1 %v2011_v18 }
 0x163   :  { %v2538_v30 = vpop.f32.mrb[9].mxu0  ;;  %2016 = vmatprep.subr.bf16.mxu1 %v2015_v25 }
 0x164   :  { %1667 = vmatprep.mubr.f32.mxu1 %v2538_v30 }
 0x165   :  { %1668 = vmatmul.mubr.f32.gmra.mrb[8].mxu1 %v2536_v29 }
 0x166   :  { %v2542_v35 = vpop.f32.mrb[10].mxu0  ;;  %2018 = vmatpush3.bf16.msra.mxu1 %v2015_v25 }
 0x167   :  { %v2544_v36 = vpop.f32.mrb[11].mxu0  ;;  %2020 = vmatprep.subr.bf16.mxu1 %v2019_v31 }
 0x168   :  { %1670 = vmatprep.mubr.f32.mxu1 %v2544_v36 }
 0x169   :  { %1671 = vmatmul.mubr.f32.gmra.mrb[10].mxu1 %v2542_v35 }
 0x16a   :  { %v2548_v41 = vpop.f32.mrb[12].mxu0  ;;  %2022 = vmatpush3.bf16.msra.mxu1 %v2019_v31 }
 0x16b   :  { %v2550_v43 = vpop.f32.mrb[13].mxu0  ;;  %2024 = vmatprep.subr.bf16.mxu1 %v2023_v37 }
 0x16c   :  { %1673 = vmatprep.mubr.f32.mxu1 %v2550_v43 }
 0x16d   :  { %1674 = vmatmul.mubr.f32.gmra.mrb[12].mxu1 %v2548_v41 }
 0x16e   :  { %v2554_v48 = vpop.f32.mrb[14].mxu0  ;;  %2026 = vmatpush3.bf16.msra.mxu1 %v2023_v37 }
 0x16f   :  { %v2556_v49 = vpop.f32.mrb[15].mxu0  ;;  %2028 = vmatprep.subr.bf16.mxu1 %v2027_v44 }
 0x170   :  { %1676 = vmatprep.mubr.f32.mxu1 %v2556_v49 }
 0x171   :  { %1677 = vmatmul.mubr.f32.gmra.mrb[14].mxu1 %v2554_v48 }
 0x172   :  { %2030 = vmatpush3.bf16.msra.mxu1 %v2027_v44  ;;  %1767 = vmatprep.mubr.f32.mxu1 %v2415_v9 }
 0x173   :  { %2064 = vmatprep.subr.bf16.mxu1 %v2418_v19 }
 0x175   :  { %1768 = vmatmul.mubr.f32.vlgmr.msra.gmra.mrb[16].mxu1 %v2440_v45 }
 0x176   :  { %1770 = vmatprep.mubr.f32.mxu1 %v2445_v47  ;;  %2066 = vmatpush3.bf16.msra.mxu1 %v2418_v19 }
 0x177   :  { %2068 = vmatprep.subr.bf16.mxu1 %v2420_v20 }
 0x179   :  { %1771 = vmatmul.mubr.f32.gmra.mrb[18].mxu1 %v2451_v50 }
 0x17a   :  { %1773 = vmatprep.mubr.f32.mxu1 %v2456_v52  ;;  %2070 = vmatpush3.bf16.msra.mxu1 %v2420_v20 }
 0x17b   :  { %2072 = vmatprep.subr.bf16.mxu1 %v2425_v26 }
 0x17d   :  { %1774 = vmatmul.mubr.f32.gmra.mrb[20].mxu1 %v2463_v53 }
 0x17e   :  { %1776 = vmatprep.mubr.f32.mxu1 %v2466_v54  ;;  %2074 = vmatpush3.bf16.msra.mxu1 %v2425_v26 }
 0x17f   :  { %2076 = vmatprep.subr.bf16.mxu1 %v2429_v32 }
 0x181   :  { %1777 = vmatmul.mubr.f32.gmra.mrb[22].mxu1 %v2473_v55 }
 0x182   :  { %1779 = vmatprep.mubr.f32.mxu1 %v2475_v56  ;;  %2078 = vmatpush3.bf16.msra.mxu1 %v2429_v32 }
 0x183   :  { %2080 = vmatprep.subr.bf16.mxu1 %v2433_v38 }
 0x185   :  { %1780 = vmatmul.mubr.f32.gmra.mrb[24].mxu1 %v2481_v57 }
 0x186   :  { %1782 = vmatprep.mubr.f32.mxu1 %v2483_v58  ;;  %2082 = vmatpush3.bf16.msra.mxu1 %v2433_v38 }
 0x187   :  { %2084 = vmatprep.subr.bf16.mxu1 %v2437_v42 }
 0x189   :  { %1783 = vmatmul.mubr.f32.gmra.mrb[26].mxu1 %v2489_v59 }
 0x18a   :  { %1785 = vmatprep.mubr.f32.mxu1 %v2491_v60  ;;  %2086 = vmatpush3.bf16.msra.mxu1 %v2437_v42 }
 0x18b   :  { %2088 = vmatprep.subr.bf16.mxu1 %v2443_v46 }
 0x18d   :  { %1786 = vmatmul.mubr.f32.gmra.mrb[28].mxu1 %v2497_v61 }
 0x18e   :  { %1788 = vmatprep.mubr.f32.mxu1 %v2499_v62  ;;  %2090 = vmatpush3.bf16.msra.mxu1 %v2443_v46 }
 0x18f   :  { %2092 = vmatprep.subr.bf16.mxu1 %v2454_v51 }
 0x191   :  { %1789 = vmatmul.mubr.f32.gmra.mrb[30].mxu1 %v2505_v63 }
 0x192   :  { %2094 = vmatpush3.bf16.msra.mxu1 %v2454_v51 }
 0x228   :  { %v1657_v9 = vpop.f32.mrb[0].mxu1 }
 0x229   :  { %v426_v45 = vmul.f32 0.015625, %v1657_v9  ;;  %v346_v47 = vpop.f32.mrb[1].mxu1 }
 0x22a   :  { %v425_v50 = vmul.f32 0.015625, %v346_v47 }
 0x22b   :  { %v2593_v52 = vsub.f32 %v2512_v5, %v426_v45 }
 0x22c   :  { %v2596_v53 = vsub.f32 %v2514_v6, %v425_v50  ;;  %v1660_v54 = vpop.f32.mrb[2].mxu1 }
 0x22d   :  { %v428_v55 = vmul.f32 0.015625, %v1660_v54  ;;  %v356_v56 = vpop.f32.mrb[3].mxu1  ;;  %v458_v59 = vmul.f32 %v2593_v52, %v2593_v52 }
 0x22e   :  { %v427_v57 = vmul.f32 0.015625, %v356_v56  ;;  %v457_v58 = vmul.f32 %v2596_v53, %v2596_v53 }
 0x22f   :  { %v2603_v60 = vsub.f32 %v2518_v11, %v428_v55 }
 0x230   :  { %v2606_v61 = vsub.f32 %v2520_v12, %v427_v57  ;;  %v1663_v62 = vpop.f32.mrb[4].mxu1  ;;  %1711 = vmatprep.mubr.f32.mxu0 %v457_v58 }
 0x231   :  { %v430_v63 = vmul.f32 0.015625, %v1663_v62  ;;  %v366_v0 = vpop.f32.mrb[5].mxu1  ;;  %1712 = vmatmul.mubr.f32.vlgmr.msra.gmra.mrb[16].mxu0 %v458_v59  ;;  %v460_v4 = vmul.f32 %v2603_v60, %v2603_v60 }
 0x232   :  { %v429_v1 = vmul.f32 0.015625, %v366_v0  ;;  %2034 = vmatpush3.bf16.msra.mxu0 %v2418_v19  ;;  %v459_v2 = vmul.f32 %v2606_v61, %v2606_v61 }
 0x233   :  { %v2612_v3 = vsub.f32 %v2524_v16, %v430_v63  ;;  %2036 = vmatprep.subr.bf16.mxu0 %v2420_v20 }
 0x234   :  { %v2618_v5 = vsub.f32 %v2526_v17, %v429_v1  ;;  %v1666_v6 = vpop.f32.mrb[6].mxu1  ;;  %1714 = vmatprep.mubr.f32.mxu0 %v459_v2 }
 0x235   :  { %v432_v7 = vmul.f32 0.015625, %v1666_v6  ;;  %v376_v8 = vpop.f32.mrb[7].mxu1  ;;  %1715 = vmatmul.mubr.f32.gmra.mrb[18].mxu0 %v460_v4  ;;  %v462_v12 = vmul.f32 %v2612_v3, %v2612_v3 }
 0x236   :  { %v431_v19 = vmul.f32 0.015625, %v376_v8  ;;  %2038 = vmatpush3.bf16.msra.mxu0 %v2420_v20  ;;  %v461_v10 = vmul.f32 %v2618_v5, %v2618_v5 }
 0x237   :  { %v2624_v11 = vsub.f32 %v2530_v23, %v432_v7  ;;  %2040 = vmatprep.subr.bf16.mxu0 %v2425_v26 }
 0x238   :  { %v2630_v13 = vsub.f32 %v2532_v24, %v431_v19  ;;  %v1669_v14 = vpop.f32.mrb[8].mxu1  ;;  %1717 = vmatprep.mubr.f32.mxu0 %v461_v10 }
 0x239   :  { %v434_v15 = vmul.f32 0.015625, %v1669_v14  ;;  %v386_v16 = vpop.f32.mrb[9].mxu1  ;;  %1718 = vmatmul.mubr.f32.gmra.mrb[20].mxu0 %v462_v12  ;;  %v464_v21 = vmul.f32 %v2624_v11, %v2624_v11 }
 0x23a   :  { %v433_v20 = vmul.f32 0.015625, %v386_v16  ;;  %2042 = vmatpush3.bf16.msra.mxu0 %v2425_v26  ;;  %v463_v17 = vmul.f32 %v2630_v13, %v2630_v13 }
 0x23b   :  { %v2636_v18 = vsub.f32 %v2536_v29, %v434_v15  ;;  %2044 = vmatprep.subr.bf16.mxu0 %v2429_v32 }
 0x23c   :  { %v2642_v22 = vsub.f32 %v2538_v30, %v433_v20  ;;  %v1672_v23 = vpop.f32.mrb[10].mxu1  ;;  %1720 = vmatprep.mubr.f32.mxu0 %v463_v17 }
 0x23d   :  { %v436_v24 = vmul.f32 0.015625, %v1672_v23  ;;  %v396_v25 = vpop.f32.mrb[11].mxu1  ;;  %1721 = vmatmul.mubr.f32.gmra.mrb[22].mxu0 %v464_v21  ;;  %v466_v29 = vmul.f32 %v2636_v18, %v2636_v18 }
 0x23e   :  { %v435_v26 = vmul.f32 0.015625, %v396_v25  ;;  %2046 = vmatpush3.bf16.msra.mxu0 %v2429_v32  ;;  %v465_v27 = vmul.f32 %v2642_v22, %v2642_v22 }
 0x23f   :  { %v2648_v28 = vsub.f32 %v2542_v35, %v436_v24  ;;  %2048 = vmatprep.subr.bf16.mxu0 %v2433_v38 }
 0x240   :  { %v2654_v30 = vsub.f32 %v2544_v36, %v435_v26  ;;  %v1675_v31 = vpop.f32.mrb[12].mxu1  ;;  %1723 = vmatprep.mubr.f32.mxu0 %v465_v27 }
 0x241   :  { %v438_v33 = vmul.f32 0.015625, %v1675_v31  ;;  %v406_v34 = vpop.f32.mrb[13].mxu1  ;;  %1724 = vmatmul.mubr.f32.gmra.mrb[24].mxu0 %v466_v29  ;;  %v468_v36 = vmul.f32 %v2648_v28, %v2648_v28 }
 0x242   :  { %v437_v32 = vmul.f32 0.015625, %v406_v34  ;;  %2050 = vmatpush3.bf16.msra.mxu0 %v2433_v38  ;;  %v467_v35 = vmul.f32 %v2654_v30, %v2654_v30 }
 0x243   :  { %v2660_v37 = vsub.f32 %v2548_v41, %v438_v33  ;;  %2052 = vmatprep.subr.bf16.mxu0 %v2437_v42 }
 0x244   :  { %v2666_v39 = vsub.f32 %v2550_v43, %v437_v32  ;;  %v1678_v40 = vpop.f32.mrb[14].mxu1  ;;  %1726 = vmatprep.mubr.f32.mxu0 %v467_v35 }
 0x245   :  { %v440_v44 = vmul.f32 0.015625, %v1678_v40  ;;  %v416_v9 = vpop.f32.mrb[15].mxu1  ;;  %1727 = vmatmul.mubr.f32.gmra.mrb[26].mxu0 %v468_v36  ;;  %v470_v43 = vmul.f32 %v2660_v37, %v2660_v37  ;;  %v2735_v36 = vld [vmem:[#allocation8] ss:$0 sm:$0xff] }
 0x246   :  { %v439_v38 = vmul.f32 0.015625, %v416_v9  ;;  %2054 = vmatpush3.bf16.msra.mxu0 %v2437_v42  ;;  %v469_v41 = vmul.f32 %v2666_v39, %v2666_v39 }
 0x247   :  { %v2672_v45 = vsub.f32 %v2554_v48, %v440_v44  ;;  %2056 = vmatprep.subr.bf16.mxu0 %v2443_v46 }
 0x248   :  { %v2678_v47 = vsub.f32 %v2556_v49, %v439_v38  ;;  %1729 = vmatprep.mubr.f32.mxu0 %v469_v41  ;;  %v2680_v50 = vpop.f32.mrb[16].mxu1 }
 0x249   :  { %1730 = vmatmul.mubr.f32.gmra.mrb[28].mxu0 %v470_v43  ;;  %v2682_v54 = vpop.f32.mrb[17].mxu1  ;;  %v472_v48 = vmul.f32 %v2672_v45, %v2672_v45  ;;  %v2738_v43 = vld [vmem:[#allocation10] ss:$0 sm:$0xff] }
 0x24a   :  { %2058 = vmatpush3.bf16.msra.mxu0 %v2443_v46  ;;  %v471_v42 = vmul.f32 %v2678_v47, %v2678_v47 }
 0x24b   :  { %2060 = vmatprep.subr.bf16.mxu0 %v2454_v51 }
 0x24c   :  { %1732 = vmatprep.mubr.f32.mxu0 %v471_v42  ;;  %v2690_v55 = vpop.f32.mrb[18].mxu1 }
 0x24d   :  { %1733 = vmatmul.mubr.f32.gmra.mrb[30].mxu0 %v472_v48  ;;  %v2692_v49 = vpop.f32.mrb[19].mxu1 }
 0x24e   :  { %2062 = vmatpush3.bf16.msra.mxu0 %v2454_v51  ;;  %1823 = vmatprep.mubr.f32.mxu0 %v2682_v54 }
 0x250   :  { %v2696_v56 = vpop.f32.mrb[20].mxu1 }
 0x251   :  { %1824 = vmatmul.mubr.f32.vlgmr.msra.gmra.mrb[32].mxu0 %v2680_v50  ;;  %v2699_v46 = vpop.f32.mrb[21].mxu1 }
 0x252   :  { %1826 = vmatprep.mubr.f32.mxu0 %v2692_v49 }
 0x254   :  { %v2702_v57 = vpop.f32.mrb[22].mxu1 }
 0x255   :  { %1827 = vmatmul.mubr.f32.gmra.mrb[34].mxu0 %v2690_v55  ;;  %v2705_v58 = vpop.f32.mrb[23].mxu1 }
 0x256   :  { %1829 = vmatprep.mubr.f32.mxu0 %v2699_v46 }
 0x258   :  { %v2708_v59 = vpop.f32.mrb[24].mxu1 }
 0x259   :  { %1830 = vmatmul.mubr.f32.gmra.mrb[36].mxu0 %v2696_v56  ;;  %v2711_v51 = vpop.f32.mrb[25].mxu1 }
 0x25a   :  { %1832 = vmatprep.mubr.f32.mxu0 %v2705_v58 }
 0x25c   :  { %v2714_v62 = vpop.f32.mrb[26].mxu1 }
 0x25d   :  { %1833 = vmatmul.mubr.f32.gmra.mrb[38].mxu0 %v2702_v57  ;;  %v2717_v63 = vpop.f32.mrb[27].mxu1 }
 0x25e   :  { %1835 = vmatprep.mubr.f32.mxu0 %v2711_v51 }
 0x260   :  { %v2720_v0 = vpop.f32.mrb[28].mxu1 }
 0x261   :  { %1836 = vmatmul.mubr.f32.gmra.mrb[40].mxu0 %v2708_v59  ;;  %v2723_v1 = vpop.f32.mrb[29].mxu1 }
 0x262   :  { %1838 = vmatprep.mubr.f32.mxu0 %v2717_v63 }
 0x264   :  { %v2726_v2 = vpop.f32.mrb[30].mxu1 }
 0x265   :  { %1839 = vmatmul.mubr.f32.gmra.mrb[42].mxu0 %v2714_v62  ;;  %v2729_v4 = vpop.f32.mrb[31].mxu1 }
 0x266   :  { %1841 = vmatprep.mubr.f32.mxu0 %v2723_v1 }
 0x269   :  { %1842 = vmatmul.mubr.f32.gmra.mrb[44].mxu0 %v2720_v0 }
 0x26a   :  { %1844 = vmatprep.mubr.f32.mxu0 %v2729_v4 }
 0x26d   :  { %1845 = vmatmul.mubr.f32.gmra.mrb[46].mxu0 %v2726_v2 }
 0x304   :  { %v1713_v6 = vpop.f32.mrb[16].mxu0 }
 0x305   :  { %v619_v7 = vmul.f32 0.015625, %v1713_v6  ;;  %v539_v8 = vpop.f32.mrb[17].mxu0 }
 0x306   :  { %v618_v19 = vmul.f32 0.015625, %v539_v8 }
 0x307   :  { %v635_v10 = vadd.f32 1e-05, %v619_v7 }
 0x308   :  { %v634_v12 = vadd.f32 1e-05, %v618_v19  ;;  %v1716_v14 = vpop.f32.mrb[18].mxu0 }
 0x309   :  { %2105 = vrsqrt.f32 %v635_v10  ;;  %v621_v15 = vmul.f32 0.015625, %v1716_v14  ;;  %v549_v16 = vpop.f32.mrb[19].mxu0 }
 0x30a   :  { %2107 = vrsqrt.f32 %v634_v12  ;;  %v620_v20 = vmul.f32 0.015625, %v549_v16 }
 0x30b   :  { %v637_v17 = vadd.f32 1e-05, %v621_v15 }
 0x30c   :  { %v636_v21 = vadd.f32 1e-05, %v620_v20  ;;  %v1719_v23 = vpop.f32.mrb[20].mxu0 }
 0x30d   :  { %2109 = vrsqrt.f32 %v637_v17  ;;  %v623_v24 = vmul.f32 0.015625, %v1719_v23  ;;  %v559_v25 = vpop.f32.mrb[21].mxu0 }
 0x30e   :  { %2111 = vrsqrt.f32 %v636_v21  ;;  %v622_v26 = vmul.f32 0.015625, %v559_v25 }
 0x30f   :  { %v639_v27 = vadd.f32 1e-05, %v623_v24 }
 0x310   :  { %v638_v29 = vadd.f32 1e-05, %v622_v26  ;;  %v1722_v31 = vpop.f32.mrb[22].mxu0 }
 0x311   :  { %2113 = vrsqrt.f32 %v639_v27  ;;  %v625_v33 = vmul.f32 0.015625, %v1722_v31  ;;  %v569_v34 = vpop.f32.mrb[23].mxu0 }
 0x312   :  { %2115 = vrsqrt.f32 %v638_v29  ;;  %v624_v32 = vmul.f32 0.015625, %v569_v34 }
 0x313   :  { %v2106_v35 = vpop.eup %2105  ;;  %v641_v40 = vadd.f32 1e-05, %v625_v33 }
 0x314   :  { %v2108_v44 = vpop.eup %2107  ;;  %v667_v9 = vmul.f32 %v2106_v35, %v2593_v52  ;;  %v640_v38 = vadd.f32 1e-05, %v624_v32  ;;  %v1725_v41 = vpop.f32.mrb[24].mxu0 }
 0x315   :  { %v666_v42 = vmul.f32 %v2108_v44, %v2596_v53  ;;  %2117 = vrsqrt.f32 %v641_v40  ;;  %v627_v48 = vmul.f32 0.015625, %v1725_v41  ;;  %v579_v6 = vpop.f32.mrb[25].mxu0 }
 0x316   :  { %v689_v7 = vmul.f32 %v2735_v36, %v667_v9  ;;  %2119 = vrsqrt.f32 %v640_v38  ;;  %v626_v8 = vmul.f32 0.015625, %v579_v6 }
 0x317   :  { %v2110_v19 = vpop.eup %2109  ;;  %v688_v10 = vmul.f32 %v2735_v36, %v666_v42  ;;  %v643_v12 = vadd.f32 1e-05, %v627_v48 }
 0x318   :  { %v2112_v14 = vpop.eup %2111  ;;  %v711_v52 = vadd.f32 %v2738_v43, %v689_v7  ;;  %v669_v15 = vmul.f32 %v2110_v19, %v2603_v60  ;;  %v642_v16 = vadd.f32 1e-05, %v626_v8  ;;  %v1728_v20 = vpop.f32.mrb[26].mxu0 }
 0x319   :  { %v710_v53 = vadd.f32 %v2738_v43, %v688_v10  ;;  %v668_v17 = vmul.f32 %v2112_v14, %v2606_v61  ;;  %2121 = vrsqrt.f32 %v643_v12  ;;  %v629_v21 = vmul.f32 0.015625, %v1728_v20  ;;  %v589_v23 = vpop.f32.mrb[27].mxu0 }
 0x31a   :  { %727 = vst [vmem:[#allocation11 + $0x10] sm:$0xff] %v711_v52  ;;  %v691_v24 = vmul.f32 %v2735_v36, %v669_v15  ;;  %2123 = vrsqrt.f32 %v642_v16  ;;  %v628_v25 = vmul.f32 0.015625, %v589_v23 }
 0x31b   :  { %v2114_v26 = vpop.eup %2113  ;;  %726 = vst [vmem:[#allocation11] sm:$0xff] %v710_v53  ;;  %v690_v27 = vmul.f32 %v2735_v36, %v668_v17  ;;  %v645_v29 = vadd.f32 1e-05, %v629_v21 }
 0x31c   :  { %v2116_v60 = vpop.eup %2115  ;;  %v713_v31 = vadd.f32 %v2738_v43, %v691_v24  ;;  %v671_v33 = vmul.f32 %v2114_v26, %v2612_v3  ;;  %v644_v34 = vadd.f32 1e-05, %v628_v25  ;;  %v1731_v61 = vpop.f32.mrb[28].mxu0 }
 0x31d   :  { %v712_v32 = vadd.f32 %v2738_v43, %v690_v27  ;;  %v670_v35 = vmul.f32 %v2116_v60, %v2618_v5  ;;  %2125 = vrsqrt.f32 %v645_v29  ;;  %v631_v40 = vmul.f32 0.015625, %v1731_v61  ;;  %v599_v44 = vpop.f32.mrb[29].mxu0 }
 0x31e   :  { %729 = vst [vmem:[#allocation11 + $0x30] sm:$0xff] %v713_v31  ;;  %v693_v9 = vmul.f32 %v2735_v36, %v671_v33  ;;  %2127 = vrsqrt.f32 %v644_v34  ;;  %v630_v38 = vmul.f32 0.015625, %v599_v44 }
 0x31f   :  { %v2118_v41 = vpop.eup %2117  ;;  %728 = vst [vmem:[#allocation11 + $0x20] sm:$0xff] %v712_v32  ;;  %v692_v42 = vmul.f32 %v2735_v36, %v670_v35  ;;  %v647_v48 = vadd.f32 1e-05, %v631_v40 }
 0x320   :  { %v2120_v3 = vpop.eup %2119  ;;  %v715_v6 = vadd.f32 %v2738_v43, %v693_v9  ;;  %v673_v7 = vmul.f32 %v2118_v41, %v2624_v11  ;;  %v646_v8 = vadd.f32 1e-05, %v630_v38  ;;  %v1734_v5 = vpop.f32.mrb[30].mxu0 }
 0x321   :  { %v714_v19 = vadd.f32 %v2738_v43, %v692_v42  ;;  %v672_v10 = vmul.f32 %v2120_v3, %v2630_v13  ;;  %2129 = vrsqrt.f32 %v647_v48  ;;  %v633_v12 = vmul.f32 0.015625, %v1734_v5  ;;  %v609_v14 = vpop.f32.mrb[31].mxu0 }
 0x322   :  { %731 = vst [vmem:[#allocation11 + $0x50] sm:$0xff] %v715_v6  ;;  %v695_v52 = vmul.f32 %v2735_v36, %v673_v7  ;;  %2131 = vrsqrt.f32 %v646_v8  ;;  %v632_v15 = vmul.f32 0.015625, %v609_v14 }
 0x323   :  { %v2122_v16 = vpop.eup %2121  ;;  %730 = vst [vmem:[#allocation11 + $0x40] sm:$0xff] %v714_v19  ;;  %v694_v20 = vmul.f32 %v2735_v36, %v672_v10  ;;  %v649_v53 = vadd.f32 1e-05, %v633_v12 }
 0x324   :  { %v2124_v11 = vpop.eup %2123  ;;  %v717_v17 = vadd.f32 %v2738_v43, %v695_v52  ;;  %v675_v21 = vmul.f32 %v2122_v16, %v2636_v18  ;;  %v648_v23 = vadd.f32 1e-05, %v632_v15  ;;  %v1825_v13 = vpop.f32.mrb[32].mxu0 }
 0x325   :  { %v716_v24 = vadd.f32 %v2738_v43, %v694_v20  ;;  %v674_v25 = vmul.f32 %v2124_v11, %v2642_v22  ;;  %2133 = vrsqrt.f32 %v649_v53  ;;  %v1049_v26 = vmul.f32 0.015625, %v1825_v13  ;;  %v969_v27 = vpop.f32.mrb[33].mxu0 }
 0x326   :  { %733 = vst [vmem:[#allocation11 + $0x70] sm:$0xff] %v717_v17  ;;  %v697_v29 = vmul.f32 %v2735_v36, %v675_v21  ;;  %2135 = vrsqrt.f32 %v648_v23  ;;  %v1048_v60 = vmul.f32 0.015625, %v969_v27 }
 0x327   :  { %v2126_v31 = vpop.eup %2125  ;;  %732 = vst [vmem:[#allocation11 + $0x60] sm:$0xff] %v716_v24  ;;  %v696_v33 = vmul.f32 %v2735_v36, %v674_v25  ;;  %v2768_v18 = vsub.f32 %v2680_v50, %v1049_v26 }
 0x328   :  { %v2128_v34 = vpop.eup %2127  ;;  %v719_v61 = vadd.f32 %v2738_v43, %v697_v29  ;;  %v677_v22 = vmul.f32 %v2126_v31, %v2648_v28  ;;  %v2773_v32 = vsub.f32 %v2682_v54, %v1048_v60  ;;  %v1828_v35 = vpop.f32.mrb[34].mxu0 }
 0x329   :  { %v718_v40 = vadd.f32 %v2738_v43, %v696_v33  ;;  %v676_v44 = vmul.f32 %v2128_v34, %v2654_v30  ;;  %v1051_v9 = vmul.f32 0.015625, %v1828_v35  ;;  %v979_v38 = vpop.f32.mrb[35].mxu0  ;;  %v1081_v54 = vmul.f32 %v2768_v18, %v2768_v18 }
 0x32a   :  { %735 = vst [vmem:[#allocation11 + $0x90] sm:$0xff] %v719_v61  ;;  %v699_v41 = vmul.f32 %v2735_v36, %v677_v22  ;;  %v1050_v50 = vmul.f32 0.015625, %v979_v38  ;;  %v1080_v42 = vmul.f32 %v2773_v32, %v2773_v32 }
 0x32b   :  { %v2130_v48 = vpop.eup %2129  ;;  %734 = vst [vmem:[#allocation11 + $0x80] sm:$0xff] %v718_v40  ;;  %v698_v28 = vmul.f32 %v2735_v36, %v676_v44  ;;  %v2784_v3 = vsub.f32 %v2690_v55, %v1051_v9 }
 0x32c   :  { %v2132_v30 = vpop.eup %2131  ;;  %v721_v6 = vadd.f32 %v2738_v43, %v699_v41  ;;  %v679_v7 = vmul.f32 %v2130_v48, %v2660_v37  ;;  %v2789_v8 = vsub.f32 %v2692_v49, %v1050_v50  ;;  %v1831_v5 = vpop.f32.mrb[36].mxu0  ;;  %1879 = vmatprep.mubr.f32.mxu1 %v1080_v42 }
 0x32d   :  { %v720_v19 = vadd.f32 %v2738_v43, %v698_v28  ;;  %v678_v10 = vmul.f32 %v2132_v30, %v2666_v39  ;;  %v1053_v12 = vmul.f32 0.015625, %v1831_v5  ;;  %v989_v14 = vpop.f32.mrb[37].mxu0  ;;  %1880 = vmatmul.mubr.f32.vlgmr.msra.gmra.mrb[32].mxu1 %v1081_v54  ;;  %v1083_v39 = vmul.f32 %v2784_v3, %v2784_v3 }
 0x32e   :  { %737 = vst [vmem:[#allocation11 + $0xb0] sm:$0xff] %v721_v6  ;;  %v701_v55 = vmul.f32 %v2735_v36, %v679_v7  ;;  %v1052_v52 = vmul.f32 0.015625, %v989_v14  ;;  %v1082_v15 = vmul.f32 %v2789_v8, %v2789_v8 }
 0x32f   :  { %v2134_v37 = vpop.eup %2133  ;;  %736 = vst [vmem:[#allocation11 + $0xa0] sm:$0xff] %v720_v19  ;;  %v700_v49 = vmul.f32 %v2735_v36, %v678_v10  ;;  %v2798_v16 = vsub.f32 %v2696_v56, %v1053_v12 }
 0x330   :  { %v2136_v20 = vpop.eup %2135  ;;  %v723_v53 = vadd.f32 %v2738_v43, %v701_v55  ;;  %v681_v11 = vmul.f32 %v2134_v37, %v2672_v45  ;;  %v2805_v17 = vsub.f32 %v2699_v46, %v1052_v52  ;;  %v1834_v21 = vpop.f32.mrb[38].mxu0  ;;  %1882 = vmatprep.mubr.f32.mxu1 %v1082_v15 }
 0x331   :  { %v722_v23 = vadd.f32 %v2738_v43, %v700_v49  ;;  %v680_v13 = vmul.f32 %v2136_v20, %v2678_v47  ;;  %v1055_v24 = vmul.f32 0.015625, %v1834_v21  ;;  %v999_v56 = vpop.f32.mrb[39].mxu0  ;;  %1883 = vmatmul.mubr.f32.gmra.mrb[34].mxu1 %v1083_v39  ;;  %v1085_v29 = vmul.f32 %v2798_v16, %v2798_v16 }
 0x332   :  { %739 = vst [vmem:[#allocation11 + $0xd0] sm:$0xff] %v723_v53  ;;  %v703_v25 = vmul.f32 %v2735_v36, %v681_v11  ;;  %v1054_v26 = vmul.f32 0.015625, %v999_v56  ;;  %v1084_v27 = vmul.f32 %v2805_v17, %v2805_v17 }
 0x333   :  { %738 = vst [vmem:[#allocation11 + $0xc0] sm:$0xff] %v722_v23  ;;  %v702_v45 = vmul.f32 %v2735_v36, %v680_v13  ;;  %v2814_v46 = vsub.f32 %v2702_v57, %v1055_v24 }
 0x334   :  { %v725_v47 = vadd.f32 %v2738_v43, %v703_v25  ;;  %v2820_v60 = vsub.f32 %v2705_v58, %v1054_v26  ;;  %v1837_v31 = vpop.f32.mrb[40].mxu0  ;;  %1885 = vmatprep.mubr.f32.mxu1 %v1084_v27 }
 0x335   :  { %v724_v33 = vadd.f32 %v2738_v43, %v702_v45  ;;  %v1057_v34 = vmul.f32 0.015625, %v1837_v31  ;;  %v1009_v61 = vpop.f32.mrb[41].mxu0  ;;  %1886 = vmatmul.mubr.f32.gmra.mrb[36].mxu1 %v1085_v29  ;;  %v1087_v58 = vmul.f32 %v2814_v46, %v2814_v46 }
 0x336   :  { %741 = vst [vmem:[#allocation11 + $0xf0] sm:$0xff] %v725_v47  ;;  %v1056_v22 = vmul.f32 0.015625, %v1009_v61  ;;  %v1086_v57 = vmul.f32 %v2820_v60, %v2820_v60 }
 0x337   :  { %740 = vst [vmem:[#allocation11 + $0xe0] sm:$0xff] %v724_v33  ;;  %v2826_v35 = vsub.f32 %v2708_v59, %v1057_v34 }
 0x338   :  { %v2831_v40 = vsub.f32 %v2711_v51, %v1056_v22  ;;  %v1840_v44 = vpop.f32.mrb[42].mxu0  ;;  %1888 = vmatprep.mubr.f32.mxu1 %v1086_v57 }
 0x339   :  { %v1059_v9 = vmul.f32 0.015625, %v1840_v44  ;;  %v1019_v38 = vpop.f32.mrb[43].mxu0  ;;  %1889 = vmatmul.mubr.f32.gmra.mrb[38].mxu1 %v1087_v58  ;;  %v1089_v59 = vmul.f32 %v2826_v35, %v2826_v35 }
 0x33a   :  { %v1058_v41 = vmul.f32 0.015625, %v1019_v38  ;;  %v1088_v50 = vmul.f32 %v2831_v40, %v2831_v40 }
 0x33b   :  { %v2836_v42 = vsub.f32 %v2714_v62, %v1059_v9 }
 0x33c   :  { %v2841_v48 = vsub.f32 %v2717_v63, %v1058_v41  ;;  %v1843_v51 = vpop.f32.mrb[44].mxu0  ;;  %1891 = vmatprep.mubr.f32.mxu1 %v1088_v50 }
 0x33d   :  { %v1061_v28 = vmul.f32 0.015625, %v1843_v51  ;;  %v1029_v54 = vpop.f32.mrb[45].mxu0  ;;  %1892 = vmatmul.mubr.f32.gmra.mrb[40].mxu1 %v1089_v59  ;;  %v1091_v62 = vmul.f32 %v2836_v42, %v2836_v42 }
 0x33e   :  { %v1060_v30 = vmul.f32 0.015625, %v1029_v54  ;;  %v1090_v6 = vmul.f32 %v2841_v48, %v2841_v48 }
 0x33f   :  { %v2846_v7 = vsub.f32 %v2720_v0, %v1061_v28 }
 0x340   :  { %v2851_v5 = vsub.f32 %v2723_v1, %v1060_v30  ;;  %v1846_v63 = vpop.f32.mrb[46].mxu0  ;;  %1894 = vmatprep.mubr.f32.mxu1 %v1090_v6 }
 0x341   :  { %v1063_v19 = vmul.f32 0.015625, %v1846_v63  ;;  %v1039_v10 = vpop.f32.mrb[47].mxu0  ;;  %1895 = vmatmul.mubr.f32.gmra.mrb[42].mxu1 %v1091_v62  ;;  %v1093_v0 = vmul.f32 %v2846_v7, %v2846_v7 }
 0x342   :  { %v1062_v12 = vmul.f32 0.015625, %v1039_v10  ;;  %v1092_v14 = vmul.f32 %v2851_v5, %v2851_v5 }
 0x343   :  { %v2856_v55 = vsub.f32 %v2726_v2, %v1063_v19 }
 0x344   :  { %v2861_v52 = vsub.f32 %v2729_v4, %v1062_v12  ;;  %1897 = vmatprep.mubr.f32.mxu1 %v1092_v14 }
 0x345   :  { %1898 = vmatmul.mubr.f32.gmra.mrb[44].mxu1 %v1093_v0  ;;  %v1095_v15 = vmul.f32 %v2856_v55, %v2856_v55 }
 0x346   :  { %v1094_v1 = vmul.f32 %v2861_v52, %v2861_v52 }
 0x348   :  { %1900 = vmatprep.mubr.f32.mxu1 %v1094_v1 }
 0x349   :  { %1901 = vmatmul.mubr.f32.gmra.mrb[46].mxu1 %v1095_v15 }
 0x400   :  { %v1881_v37 = vpop.f32.mrb[32].mxu1 }
 0x401   :  { %v1242_v49 = vmul.f32 0.015625, %v1881_v37  ;;  %v1162_v2 = vpop.f32.mrb[33].mxu1 }
 0x402   :  { %v1241_v39 = vmul.f32 0.015625, %v1162_v2 }
 0x403   :  { %v1258_v20 = vadd.f32 1e-05, %v1242_v49 }
 0x404   :  { %v1257_v53 = vadd.f32 1e-05, %v1241_v39  ;;  %v1884_v11 = vpop.f32.mrb[34].mxu1 }
 0x405   :  { %2137 = vrsqrt.f32 %v1258_v20  ;;  %v1244_v4 = vmul.f32 0.015625, %v1884_v11  ;;  %v1172_v21 = vpop.f32.mrb[35].mxu1 }
 0x406   :  { %2139 = vrsqrt.f32 %v1257_v53  ;;  %v1243_v23 = vmul.f32 0.015625, %v1172_v21 }
 0x407   :  { %v1260_v13 = vadd.f32 1e-05, %v1244_v4 }
 0x408   :  { %v1259_v24 = vadd.f32 1e-05, %v1243_v23  ;;  %v1887_v56 = vpop.f32.mrb[36].mxu1 }
 0x409   :  { %2141 = vrsqrt.f32 %v1260_v13  ;;  %v1246_v25 = vmul.f32 0.015625, %v1887_v56  ;;  %v1182_v26 = vpop.f32.mrb[37].mxu1 }
 0x40a   :  { %2143 = vrsqrt.f32 %v1259_v24  ;;  %v1245_v27 = vmul.f32 0.015625, %v1182_v26 }
 0x40b   :  { %v1262_v45 = vadd.f32 1e-05, %v1246_v25 }
 0x40c   :  { %v1261_v29 = vadd.f32 1e-05, %v1245_v27  ;;  %v1890_v47 = vpop.f32.mrb[38].mxu1 }
 0x40d   :  { %2145 = vrsqrt.f32 %v1262_v45  ;;  %v1248_v31 = vmul.f32 0.015625, %v1890_v47  ;;  %v1192_v33 = vpop.f32.mrb[39].mxu1 }
 0x40e   :  { %2147 = vrsqrt.f32 %v1261_v29  ;;  %v1247_v34 = vmul.f32 0.015625, %v1192_v33 }
 0x40f   :  { %v2138_v61 = vpop.eup %2137  ;;  %v1264_v22 = vadd.f32 1e-05, %v1248_v31 }
 0x410   :  { %v2140_v57 = vpop.eup %2139  ;;  %v1290_v58 = vmul.f32 %v2138_v61, %v2768_v18  ;;  %v1263_v44 = vadd.f32 1e-05, %v1247_v34  ;;  %v1893_v9 = vpop.f32.mrb[40].mxu1 }
 0x411   :  { %v1289_v38 = vmul.f32 %v2140_v57, %v2773_v32  ;;  %2149 = vrsqrt.f32 %v1264_v22  ;;  %v1250_v41 = vmul.f32 0.015625, %v1893_v9  ;;  %v1202_v50 = vpop.f32.mrb[41].mxu1 }
 0x412   :  { %v1306_v59 = vmul.f32 %v2735_v36, %v1290_v58  ;;  %2151 = vrsqrt.f32 %v1263_v44  ;;  %v1249_v51 = vmul.f32 0.015625, %v1202_v50 }
 0x413   :  { %v2142_v28 = vpop.eup %2141  ;;  %v1305_v54 = vmul.f32 %v2735_v36, %v1289_v38  ;;  %v1266_v30 = vadd.f32 1e-05, %v1250_v41 }
 0x414   :  { %v2144_v6 = vpop.eup %2143  ;;  %v1322_v62 = vadd.f32 %v2738_v43, %v1306_v59  ;;  %v1292_v18 = vmul.f32 %v2142_v28, %v2784_v3  ;;  %v1265_v63 = vadd.f32 1e-05, %v1249_v51  ;;  %v1896_v19 = vpop.f32.mrb[42].mxu1 }
 0x415   :  { %v1321_v32 = vadd.f32 %v2738_v43, %v1305_v54  ;;  %v1291_v10 = vmul.f32 %v2144_v6, %v2789_v8  ;;  %2153 = vrsqrt.f32 %v1266_v30  ;;  %v1252_v12 = vmul.f32 0.015625, %v1896_v19  ;;  %v1212_v14 = vpop.f32.mrb[43].mxu1 }
 0x416   :  { %1339 = vst [vmem:[#allocation11 + $0x18] sm:$0xff] %v1322_v62  ;;  %v1308_v0 = vmul.f32 %v2735_v36, %v1292_v18  ;;  %2155 = vrsqrt.f32 %v1265_v63  ;;  %v1251_v1 = vmul.f32 0.015625, %v1212_v14 }
 0x417   :  { %v2146_v15 = vpop.eup %2145  ;;  %1338 = vst [vmem:[#allocation11 + $0x8] sm:$0xff] %v1321_v32  ;;  %v1307_v37 = vmul.f32 %v2735_v36, %v1291_v10  ;;  %v1268_v49 = vadd.f32 1e-05, %v1252_v12 }
 0x418   :  { %v2148_v3 = vpop.eup %2147  ;;  %v1324_v2 = vadd.f32 %v2738_v43, %v1308_v0  ;;  %v1294_v39 = vmul.f32 %v2146_v15, %v2798_v16  ;;  %v1267_v20 = vadd.f32 1e-05, %v1251_v1  ;;  %v1899_v8 = vpop.f32.mrb[44].mxu1 }
 0x419   :  { %v1323_v53 = vadd.f32 %v2738_v43, %v1307_v37  ;;  %v1293_v11 = vmul.f32 %v2148_v3, %v2805_v17  ;;  %2157 = vrsqrt.f32 %v1268_v49  ;;  %v1254_v4 = vmul.f32 0.015625, %v1899_v8  ;;  %v1222_v21 = vpop.f32.mrb[45].mxu1 }
 0x41a   :  { %1341 = vst [vmem:[#allocation11 + $0x38] sm:$0xff] %v1324_v2  ;;  %v1310_v23 = vmul.f32 %v2735_v36, %v1294_v39  ;;  %2159 = vrsqrt.f32 %v1267_v20  ;;  %v1253_v13 = vmul.f32 0.015625, %v1222_v21 }
 0x41b   :  { %v2150_v24 = vpop.eup %2149  ;;  %1340 = vst [vmem:[#allocation11 + $0x28] sm:$0xff] %v1323_v53  ;;  %v1309_v56 = vmul.f32 %v2735_v36, %v1293_v11  ;;  %v1270_v25 = vadd.f32 1e-05, %v1254_v4 }
 0x41c   :  { %v2152_v16 = vpop.eup %2151  ;;  %v1326_v26 = vadd.f32 %v2738_v43, %v1310_v23  ;;  %v1296_v27 = vmul.f32 %v2150_v24, %v2814_v46  ;;  %v1269_v45 = vadd.f32 1e-05, %v1253_v13  ;;  %v1902_v17 = vpop.f32.mrb[46].mxu1 }
 0x41d   :  { %v1325_v29 = vadd.f32 %v2738_v43, %v1309_v56  ;;  %v1295_v47 = vmul.f32 %v2152_v16, %v2820_v60  ;;  %2161 = vrsqrt.f32 %v1270_v25  ;;  %v1256_v31 = vmul.f32 0.015625, %v1902_v17  ;;  %v1232_v33 = vpop.f32.mrb[47].mxu1 }
 0x41e   :  { %1343 = vst [vmem:[#allocation11 + $0x58] sm:$0xff] %v1326_v26  ;;  %v1312_v34 = vmul.f32 %v2735_v36, %v1296_v27  ;;  %2163 = vrsqrt.f32 %v1269_v45  ;;  %v1255_v61 = vmul.f32 0.015625, %v1232_v33 }
 0x41f   :  { %v2154_v22 = vpop.eup %2153  ;;  %1342 = vst [vmem:[#allocation11 + $0x48] sm:$0xff] %v1325_v29  ;;  %v1311_v57 = vmul.f32 %v2735_v36, %v1295_v47  ;;  %v1272_v58 = vadd.f32 1e-05, %v1256_v31 }
 0x420   :  { %v2156_v46 = vpop.eup %2155  ;;  %v1328_v44 = vadd.f32 %v2738_v43, %v1312_v34  ;;  %v1298_v9 = vmul.f32 %v2154_v22, %v2826_v35  ;;  %v1271_v38 = vadd.f32 1e-05, %v1255_v61 }
 0x421   :  { %v1327_v60 = vadd.f32 %v2738_v43, %v1311_v57  ;;  %v1297_v41 = vmul.f32 %v2156_v46, %v2831_v40  ;;  %2165 = vrsqrt.f32 %v1272_v58 }
 0x422   :  { %1345 = vst [vmem:[#allocation11 + $0x78] sm:$0xff] %v1328_v44  ;;  %v1314_v50 = vmul.f32 %v2735_v36, %v1298_v9  ;;  %2167 = vrsqrt.f32 %v1271_v38 }
 0x423   :  { %v2158_v59 = vpop.eup %2157  ;;  %1344 = vst [vmem:[#allocation11 + $0x68] sm:$0xff] %v1327_v60  ;;  %v1313_v51 = vmul.f32 %v2735_v36, %v1297_v41 }
 0x424   :  { %v2160_v28 = vpop.eup %2159  ;;  %v1330_v54 = vadd.f32 %v2738_v43, %v1314_v50  ;;  %v1300_v30 = vmul.f32 %v2158_v59, %v2836_v42 }
 0x425   :  { %v1329_v35 = vadd.f32 %v2738_v43, %v1313_v51  ;;  %v1299_v6 = vmul.f32 %v2160_v28, %v2841_v48 }
 0x426   :  { %1347 = vst [vmem:[#allocation11 + $0x98] sm:$0xff] %v1330_v54  ;;  %v1316_v40 = vmul.f32 %v2735_v36, %v1300_v30 }
 0x427   :  { %v2162_v62 = vpop.eup %2161  ;;  %1346 = vst [vmem:[#allocation11 + $0x88] sm:$0xff] %v1329_v35  ;;  %v1315_v18 = vmul.f32 %v2735_v36, %v1299_v6 }
 0x428   :  { %v2164_v63 = vpop.eup %2163  ;;  %v1332_v19 = vadd.f32 %v2738_v43, %v1316_v40  ;;  %v1302_v32 = vmul.f32 %v2162_v62, %v2846_v7 }
 0x429   :  { %v1331_v10 = vadd.f32 %v2738_v43, %v1315_v18  ;;  %v1301_v42 = vmul.f32 %v2164_v63, %v2851_v5 }
 0x42a   :  { %1349 = vst [vmem:[#allocation11 + $0xb8] sm:$0xff] %v1332_v19  ;;  %v1318_v12 = vmul.f32 %v2735_v36, %v1302_v32 }
 0x42b   :  { %v2166_v48 = vpop.eup %2165  ;;  %1348 = vst [vmem:[#allocation11 + $0xa8] sm:$0xff] %v1331_v10  ;;  %v1317_v14 = vmul.f32 %v2735_v36, %v1301_v42 }
 0x42c   :  { %v2168_v0 = vpop.eup %2167  ;;  %v1334_v1 = vadd.f32 %v2738_v43, %v1318_v12  ;;  %v1304_v15 = vmul.f32 %v2166_v48, %v2856_v55 }
 0x42d   :  { %v1333_v37 = vadd.f32 %v2738_v43, %v1317_v14  ;;  %v1303_v7 = vmul.f32 %v2168_v0, %v2861_v52 }
 0x42e   :  { %1351 = vst [vmem:[#allocation11 + $0xd8] sm:$0xff] %v1334_v1  ;;  %v1320_v49 = vmul.f32 %v2735_v36, %v1304_v15 }
 0x42f   :  { %1350 = vst [vmem:[#allocation11 + $0xc8] sm:$0xff] %v1333_v37  ;;  %v1319_v5 = vmul.f32 %v2735_v36, %v1303_v7 }
 0x430   :  { %v1336_v3 = vadd.f32 %v2738_v43, %v1320_v49 }
 0x431   :  { %v1335_v2 = vadd.f32 %v2738_v43, %v1319_v5 }
 0x432   :  { %1353 = vst [vmem:[#allocation11 + $0xf8] sm:$0xff] %v1336_v3 }
 0x433   :  { %1352 = vst [vmem:[#allocation11 + $0xe8] sm:$0xff] %v1335_v2 }
 0x434   :  { %2290 = shalt.err (!%p2287_p2)
}
 0x435   :  { %s2291_s9 = scalar_lea.hbm %s2935_s5, 4096 }
 0x436   :  { %p2292_p3 = scmp.ne.s32.totalorder %s2935_s5, %s2291_s9  ;;  %p2295_p4 = scmp.lt.u32.totalorder %s2291_s9, %s2935_s5 }
 0x438   :  { %p2297_p5 = pnand %p2295_p4, %p2292_p3 }
 0x43a   :  { %2300 = shalt.err (!%p2297_p5)
}
 0x43b   :  { %1365 = dma.vmem_to_hbm [thread:$0]  %s1360_s30, 4096, %s2935_s5, [#allocation4], %s2314_s3, %s2314_s3, %s2315_s29  }
 0x43c   :  { %2307 = dma.done.wait [#allocation4], 4096  }
 0x43d   :  { %2308 = vsyncadd [#allocation4], 4294963200 }
 0x43e   :  { %1369 = vsyncpa [#allocation3], 1 }
 0x43f   :  { %1370 = vsyncpa [#allocation6], 1 }
 0x440   :  { %1371 = vsyncpa [#allocation9], 1 }
 0x441   :  { %1372 = vsyncpa [#allocation4], 1 }

</bundles_post_ra>
